<compile_context>
chip_gen: v7x
topology: tpu7x:2x2x1
jax: 0.10.0
libtpu: 0.0.40
codegen_flags: <defaults>
</compile_context>

<pallas_src>
import numpy as np
import jax
import jax.numpy as jnp
from jax.experimental import pallas as pl
from jax.experimental.pallas import tpu as pltpu


ROW_PAD = 8   # embedding-table rows padded to one full sublane group


# ----------------------------- Pallas kernel --------------------------------

def _speaker_kernel(labels_ref, table_ref, o_ref):
    """Embedding lookup for 3-row table via two VPU compare+selects."""
    tm = o_ref.shape[0]
    d = o_ref.shape[1]
    lab = jnp.broadcast_to(labels_ref[...], (tm, d))              # [tm, d] int32
    row1 = jnp.broadcast_to(table_ref[1:2, :], (tm, d))           # speaker A
    row2 = jnp.broadcast_to(table_ref[2:3, :], (tm, d))           # speaker B
    o_ref[...] = (jnp.where(lab == 1, row1, 0.0)
                  + jnp.where(lab == 2, row2, 0.0))               # label 0 -> zeros


# ----------------------------- wrapper ---------------------------------------

def _choose_tm(n):
    """Row tile: >= 2 grid steps (v7x dual TC), multiple of 8, capped at 2048."""
    tm = -(-n // 2)            # cdiv(n, 2)
    tm = -(-tm // 8) * 8       # round up to a sublane multiple
    return max(8, min(tm, 2048))


def speaker_forward(speaker_labels, table, *, tm=None):
    """Speaker.forward: learned-speaker embedding lookup (dropout omitted)."""
    labels = jnp.asarray(speaker_labels, jnp.int32).reshape(-1, 1)   # [N, 1]
    n = labels.shape[0]
    if tm is None:
        tm = _choose_tm(n)
    n_pad = -(-n // tm) * tm
    if n_pad != n:
        # padded label rows are 0 -> they hit the zero (padding_idx) row and
        # are sliced off below, so they are harmless.
        labels = jnp.pad(labels, ((0, n_pad - n), (0, 0)))

    r, d = table.shape
    assert r <= ROW_PAD
    table_p = jnp.pad(table.astype(jnp.float32), ((0, ROW_PAD - r), (0, 0)))  # (8, d)

    out = pl.pallas_call(
        _speaker_kernel,
        out_shape=jax.ShapeDtypeStruct((n_pad, d), jnp.float32),
        grid=(n_pad // tm,),
        in_specs=[
            pl.BlockSpec((tm, 1), lambda i: (i, 0)),              # label block
            pl.BlockSpec((ROW_PAD, d), lambda i: (0, 0)),         # resident table
        ],
        out_specs=pl.BlockSpec((tm, d), lambda i: (i, 0)),        # payload-only out
        compiler_params=pltpu.CompilerParams(
            dimension_semantics=("parallel",)),
    )(labels, table_p)
    return out if n_pad == n else out[:n]


# ----------------------------- main ------------------------------------------

if __name__ == "__main__":
    speaker_dim = 20          # default speaker_dim in Speaker(__init__)
    num_speakers = 3          # {0: unknown/pad, 1: speaker A, 2: speaker B}
    n_labels = 300            # tokens in the document -> 2 grid steps (tm=152)

    key = jax.random.PRNGKey(0)
    k_tab, k_lab = jax.random.split(key)

    # nn.Embedding(3, speaker_dim, padding_idx=0): N(0,1) init, row 0 zeroed.
    table = jax.random.normal(k_tab, (num_speakers, speaker_dim), jnp.float32)
    table = table.at[0].set(0.0)

    speaker_labels = jax.random.randint(
        k_lab, (n_labels,), 0, num_speakers, jnp.int32)

    out = speaker_forward(speaker_labels, table)
    jax.block_until_ready(out)

    # sanity check against a plain-JAX reference (exact gather)
    ref = table[speaker_labels]
    assert out.shape == (n_labels, speaker_dim)
    np.testing.assert_allclose(np.asarray(out), np.asarray(ref),
                               rtol=0.0, atol=1e-6)

    print("KERNEL_OK")
</pallas_src>

<mosaic_0001>
module attributes {stable_mosaic.version = 11 : i64} {
  func.func @_speaker_kernel(%arg0: i32, %arg1: memref<152x1xi32, #tpu.memory_space<vmem>>, %arg2: memref<8x20xf32, #tpu.memory_space<vmem>>, %arg3: memref<152x20xf32, #tpu.memory_space<vmem>>) attributes {dimension_semantics = [#tpu.dimension_semantics<parallel>], iteration_bounds = array<i64: 2>, scalar_prefetch = 0 : i64, scratch_operands = 0 : i64, tpu.core_type = #tpu.core_type<tc>, window_params = [{transform_indices = @transform_0, window_bounds = array<i64: 152, 1>}, {pipeline_mode = #tpu.pipeline_mode<synchronous>, transform_indices = @transform_1, window_bounds = array<i64: 8, 20>}, {transform_indices = @transform_2, window_bounds = array<i64: 152, 20>}]} {
    %c0 = arith.constant 0 : index
    %c0_0 = arith.constant 0 : index
    %0 = vector.load %arg1[%c0, %c0_0] : memref<152x1xi32, #tpu.memory_space<vmem>>, vector<152x1xi32>
    %1 = vector.shape_cast %0 : vector<152x1xi32> to vector<152x1xi32>
    %2 = vector.broadcast %1 : vector<152x1xi32> to vector<152x20xi32>
    %c1 = arith.constant 1 : index
    %c0_1 = arith.constant 0 : index
    %3 = vector.load %arg2[%c1, %c0_1] : memref<8x20xf32, #tpu.memory_space<vmem>>, vector<1x20xf32>
    %4 = vector.shape_cast %3 : vector<1x20xf32> to vector<1x20xf32>
    %5 = vector.broadcast %4 : vector<1x20xf32> to vector<152x20xf32>
    %c2 = arith.constant 2 : index
    %c0_2 = arith.constant 0 : index
    %6 = vector.load %arg2[%c2, %c0_2] : memref<8x20xf32, #tpu.memory_space<vmem>>, vector<1x20xf32>
    %7 = vector.shape_cast %6 : vector<1x20xf32> to vector<1x20xf32>
    %8 = vector.broadcast %7 : vector<1x20xf32> to vector<152x20xf32>
    %c1_i32 = arith.constant 1 : i32
    %9 = vector.broadcast %c1_i32 : i32 to vector<152x20xi32>
    %10 = arith.cmpi eq, %2, %9 : vector<152x20xi32>
    %cst = arith.constant 0.000000e+00 : f32
    %11 = vector.broadcast %cst : f32 to vector<152x20xf32>
    %12 = arith.select %10, %5, %11 : vector<152x20xi1>, vector<152x20xf32>
    %c2_i32 = arith.constant 2 : i32
    %13 = vector.broadcast %c2_i32 : i32 to vector<152x20xi32>
    %14 = arith.cmpi eq, %2, %13 : vector<152x20xi32>
    %cst_3 = arith.constant 0.000000e+00 : f32
    %15 = vector.broadcast %cst_3 : f32 to vector<152x20xf32>
    %16 = arith.select %14, %8, %15 : vector<152x20xi1>, vector<152x20xf32>
    %17 = arith.addf %12, %16 : vector<152x20xf32>
    %c0_4 = arith.constant 0 : index
    %c0_5 = arith.constant 0 : index
    %18 = vector.load %arg3[%c0_4, %c0_5] : memref<152x20xf32, #tpu.memory_space<vmem>>, vector<152x20xf32>
    tpu.vector_store %arg3[%c0_4, %c0_5], %17 {strides = array<i32>} : memref<152x20xf32, #tpu.memory_space<vmem>>, vector<152x20xf32>,
    return
  }
  func.func @transform_0(%arg0: i32) -> (i32, i32) {
    %c0_i32 = arith.constant 0 : i32
    %c0_i32_0 = arith.constant 0 : i32
    return %arg0, %c0_i32 : i32, i32
  }
  func.func @transform_1(%arg0: i32) -> (i32, i32) {
    %c0_i32 = arith.constant 0 : i32
    %c0_i32_0 = arith.constant 0 : i32
    %c0_i32_1 = arith.constant 0 : i32
    return %c0_i32, %c0_i32_0 : i32, i32
  }
  func.func @transform_2(%arg0: i32) -> (i32, i32) {
    %c0_i32 = arith.constant 0 : i32
    %c0_i32_0 = arith.constant 0 : i32
    return %arg0, %c0_i32 : i32, i32
  }
}

</mosaic_0001>

<bundles_post_ra>
// kernel: tpu_custom_call.1
= control target key start
LH: loop header
LB: loop body
LE: loop exit
PB: predicated region body
PF: predicated region fallthrough
CT: control target
= control target key end

     0   :  { %s450_s9 = smov 0   ;;  %s583_s0 = inlined_call_operand.vmem [shape: s32[304,1], index: 0, kind: input, shape index: {}]   ;;  %s584_s1 = inlined_call_operand.vmem [shape: f32[8,20], index: 1, kind: input, shape index: {}]   ;;  %s585_s2 = inlined_call_operand.vmem [shape: f32[304,20], index: 2, kind: output, shape index: {}]  }
   0x1 LB: > { %s404_s10 = sadd.s32 4294967295, %s432_s9   ;;  %p408_p0 = scmp.ge.s32.totalorder %s432_s9, 1  ;;  %s432_s9 = sphi %s450_s9, %s12_s9  }
   0x2   : > { %p113_p1 = scmp.lt.s32.totalorder %s432_s9, 3 }
   0x4   : > { %p114_p2 = pnand %p408_p0, %p113_p1 }
   0x5   : > { %s135_s11 = smul.u32 (!%p114_p2), 19, %s404_s10  ;;  %v434_v0 = vmov (!%p114_p2), 0   ;;  %v490_v20 = vld [vmem:[%s584_s1 + $0x1] ss:$0 sm:$0xff] (!%p114_p2)  ;;  %v495_v21 = vld [vmem:[%s584_s1 + $0x2] ss:$0 sm:$0xff] (!%p114_p2) }
   0x6   : > { %117 = sbr.rel (%p114_p2) target bundleno = 186 (0xba), region = 28  ;;  %425 = vset.pattern.permute.xlu1 (!%p114_p2), %v434_v0  ;;  %424 = vset.pattern.permute.xlu0 (!%p114_p2), %v434_v0  ;;  %vm328_vm0 = vcmask (!%p114_p2), 162816  }
   0x7   : > { %p136_p3 = scmp.lt.s32.totalorder (!%p114_p2), %s135_s11, 37 }
   0xd   : > { %s587_s11 = smov (!%p136_p3, %s135_s11), 37 }
   0xe   : > { %s409_s12 = sshll.u32 %s587_s11, 3 }
   0xf   : > { %s466_s15 = scalar_lea.vmem %s583_s0, %s409_s12  ;;  %s502_s22 = scalar_lea.vmem %s585_s2, %s409_s12 }
  0x10   : > { %v149_v1 = vld [vmem:[%s466_s15 + $0x10] sm:$0xff]  ;;  %v147_v2 = vld [vmem:[%s466_s15] sm:$0xff]  ;;  %v150_v3 = vld [vmem:[%s466_s15 + $0x18] sm:$0xff] }
  0x11   : > { %173 = vperm.xlu1 %425, %v149_v1   ;;  %167 = vperm.xlu0 %424, %v147_v2   ;;  %v148_v4 = vld [vmem:[%s466_s15 + $0x8] sm:$0xff]  ;;  %v151_v6 = vld [vmem:[%s466_s15 + $0x20] sm:$0xff]  ;;  %v154_v7 = vld [vmem:[%s466_s15 + $0x38] sm:$0xff] }
  0x12   : > { %v152_v5 = vld [vmem:[%s466_s15 + $0x28] sm:$0xff]  ;;  %v153_v8 = vld [vmem:[%s466_s15 + $0x30] sm:$0xff]  ;;  %v155_v10 = vld [vmem:[%s466_s15 + $0x40] sm:$0xff] }
  0x13   : > { %v156_v9 = vld [vmem:[%s466_s15 + $0x48] sm:$0xff]  ;;  %v158_v11 = vld [vmem:[%s466_s15 + $0x58] sm:$0xff]  ;;  %v157_v12 = vld [vmem:[%s466_s15 + $0x50] sm:$0xff] }
  0x14   : > { %v160_v13 = vld [vmem:[%s466_s15 + $0x68] sm:$0xff]  ;;  %v159_v14 = vld [vmem:[%s466_s15 + $0x60] sm:$0xff]  ;;  %v162_v15 = vld [vmem:[%s466_s15 + $0x78] sm:$0xff] }
  0x15   : > { %176 = vperm.xlu1 %425, %v150_v3   ;;  %170 = vperm.xlu0 %424, %v148_v4   ;;  %v161_v16 = vld [vmem:[%s466_s15 + $0x70] sm:$0xff]  ;;  %v164_v17 = vld [vmem:[%s466_s15 + $0x88] sm:$0xff]  ;;  %v163_v18 = vld [vmem:[%s466_s15 + $0x80] sm:$0xff] }
  0x16   : > { %v165_v19 = vld [vmem:[%s466_s15 + $0x90] sm:$0xff] }
  0x19   : > { %182 = vperm.xlu1 %425, %v152_v5   ;;  %179 = vperm.xlu0 %424, %v151_v6  }
  0x1d   : > { %188 = vperm.xlu1 %425, %v154_v7   ;;  %185 = vperm.xlu0 %424, %v153_v8  }
  0x21   : > { %194 = vperm.xlu1 %425, %v156_v9   ;;  %191 = vperm.xlu0 %424, %v155_v10  }
  0x25   : > { %200 = vperm.xlu1 %425, %v158_v11   ;;  %197 = vperm.xlu0 %424, %v157_v12  }
  0x29   : > { %206 = vperm.xlu1 %425, %v160_v13   ;;  %203 = vperm.xlu0 %424, %v159_v14  }
  0x2d   : > { %212 = vperm.xlu1 %425, %v162_v15   ;;  %209 = vperm.xlu0 %424, %v161_v16  }
  0x31   : > { %218 = vperm.xlu1 %425, %v164_v17   ;;  %215 = vperm.xlu0 %424, %v163_v18  }
  0x35   : > { %221 = vperm.xlu0 %424, %v165_v19  }
  0x90   : > { %v174_v22 = vpop.permute.xlu1 %173  ;;  %v168_v23 = vpop.permute.xlu0 %167 }
  0x91   : > { %vm235_vm1 = vcmp.eq.s32.totalorder %v174_v22, 1  ;;  %vm273_vm2 = vcmp.eq.s32.totalorder %v174_v22, 2  ;;  %vm233_vm3 = vcmp.eq.s32.totalorder %v168_v23, 1  ;;  %vm271_vm4 = vcmp.eq.s32.totalorder %v168_v23, 2 }
  0x92   : > { %v254_v24 = vsel %vm235_vm1, %v490_v20, 0.0  ;;  %v292_v25 = vsel %vm273_vm2, %v495_v21, 0.0  ;;  %v252_v26 = vsel %vm233_vm3, %v490_v20, 0.0  ;;  %v290_v27 = vsel %vm271_vm4, %v495_v21, 0.0 }
  0x93   : > { %v311_v28 = vadd.f32 %v292_v25, %v254_v24  ;;  %v309_v29 = vadd.f32 %v290_v27, %v252_v26 }
  0x94   : > { %v177_v30 = vpop.permute.xlu1 %176  ;;  %v171_v31 = vpop.permute.xlu0 %170 }
  0x95   : > { %331 = vst.msk [vmem:[%s502_s22 + $0x10] sm:$0xff] %vm328_vm0, %v311_v28  ;;  %329 = vst.msk [vmem:[%s502_s22] sm:$0xff] %vm328_vm0, %v309_v29  ;;  %vm236_vm5 = vcmp.eq.s32.totalorder %v177_v30, 1  ;;  %vm274_vm6 = vcmp.eq.s32.totalorder %v177_v30, 2  ;;  %vm234_vm7 = vcmp.eq.s32.totalorder %v171_v31, 1  ;;  %vm272_vm8 = vcmp.eq.s32.totalorder %v171_v31, 2 }
  0x96   : > { %v255_v32 = vsel %vm236_vm5, %v490_v20, 0.0  ;;  %v293_v33 = vsel %vm274_vm6, %v495_v21, 0.0  ;;  %v253_v34 = vsel %vm234_vm7, %v490_v20, 0.0  ;;  %v291_v35 = vsel %vm272_vm8, %v495_v21, 0.0 }
  0x97   : > { %v312_v36 = vadd.f32 %v293_v33, %v255_v32  ;;  %v310_v37 = vadd.f32 %v291_v35, %v253_v34 }
  0x98   : > { %v183_v38 = vpop.permute.xlu1 %182  ;;  %v180_v39 = vpop.permute.xlu0 %179 }
  0x99   : > { %332 = vst.msk [vmem:[%s502_s22 + $0x18] sm:$0xff] %vm328_vm0, %v312_v36  ;;  %330 = vst.msk [vmem:[%s502_s22 + $0x8] sm:$0xff] %vm328_vm0, %v310_v37  ;;  %vm238_vm9 = vcmp.eq.s32.totalorder %v183_v38, 1  ;;  %vm276_vm10 = vcmp.eq.s32.totalorder %v183_v38, 2  ;;  %vm237_vm11 = vcmp.eq.s32.totalorder %v180_v39, 1  ;;  %vm275_vm12 = vcmp.eq.s32.totalorder %v180_v39, 2 }
  0x9a   : > { %v257_v40 = vsel %vm238_vm9, %v490_v20, 0.0  ;;  %v295_v41 = vsel %vm276_vm10, %v495_v21, 0.0  ;;  %v256_v42 = vsel %vm237_vm11, %v490_v20, 0.0  ;;  %v294_v43 = vsel %vm275_vm12, %v495_v21, 0.0 }
  0x9b   : > { %v314_v44 = vadd.f32 %v295_v41, %v257_v40  ;;  %v313_v45 = vadd.f32 %v294_v43, %v256_v42 }
  0x9c   : > { %v189_v46 = vpop.permute.xlu1 %188  ;;  %v186_v47 = vpop.permute.xlu0 %185 }
  0x9d   : > { %334 = vst.msk [vmem:[%s502_s22 + $0x28] sm:$0xff] %vm328_vm0, %v314_v44  ;;  %333 = vst.msk [vmem:[%s502_s22 + $0x20] sm:$0xff] %vm328_vm0, %v313_v45  ;;  %vm240_vm13 = vcmp.eq.s32.totalorder %v189_v46, 1  ;;  %vm278_vm14 = vcmp.eq.s32.totalorder %v189_v46, 2  ;;  %vm239_vm15 = vcmp.eq.s32.totalorder %v186_v47, 1  ;;  %vm277_vm1 = vcmp.eq.s32.totalorder %v186_v47, 2 }
  0x9e   : > { %v259_v48 = vsel %vm240_vm13, %v490_v20, 0.0  ;;  %v297_v49 = vsel %vm278_vm14, %v495_v21, 0.0  ;;  %v258_v50 = vsel %vm239_vm15, %v490_v20, 0.0  ;;  %v296_v51 = vsel %vm277_vm1, %v495_v21, 0.0 }
  0x9f   : > { %v316_v52 = vadd.f32 %v297_v49, %v259_v48  ;;  %v315_v53 = vadd.f32 %v296_v51, %v258_v50 }
  0xa0   : > { %v195_v54 = vpop.permute.xlu1 %194  ;;  %v192_v55 = vpop.permute.xlu0 %191 }
  0xa1   : > { %336 = vst.msk [vmem:[%s502_s22 + $0x38] sm:$0xff] %vm328_vm0, %v316_v52  ;;  %335 = vst.msk [vmem:[%s502_s22 + $0x30] sm:$0xff] %vm328_vm0, %v315_v53  ;;  %vm242_vm2 = vcmp.eq.s32.totalorder %v195_v54, 1  ;;  %vm280_vm3 = vcmp.eq.s32.totalorder %v195_v54, 2  ;;  %vm241_vm4 = vcmp.eq.s32.totalorder %v192_v55, 1  ;;  %vm279_vm5 = vcmp.eq.s32.totalorder %v192_v55, 2 }
  0xa2   : > { %v261_v56 = vsel %vm242_vm2, %v490_v20, 0.0  ;;  %v299_v57 = vsel %vm280_vm3, %v495_v21, 0.0  ;;  %v260_v58 = vsel %vm241_vm4, %v490_v20, 0.0  ;;  %v298_v59 = vsel %vm279_vm5, %v495_v21, 0.0 }
  0xa3   : > { %v318_v60 = vadd.f32 %v299_v57, %v261_v56  ;;  %v317_v61 = vadd.f32 %v298_v59, %v260_v58 }
  0xa4   : > { %v201_v62 = vpop.permute.xlu1 %200  ;;  %v198_v63 = vpop.permute.xlu0 %197 }
  0xa5   : > { %338 = vst.msk [vmem:[%s502_s22 + $0x48] sm:$0xff] %vm328_vm0, %v318_v60  ;;  %337 = vst.msk [vmem:[%s502_s22 + $0x40] sm:$0xff] %vm328_vm0, %v317_v61  ;;  %vm244_vm6 = vcmp.eq.s32.totalorder %v201_v62, 1  ;;  %vm282_vm7 = vcmp.eq.s32.totalorder %v201_v62, 2  ;;  %vm243_vm8 = vcmp.eq.s32.totalorder %v198_v63, 1  ;;  %vm281_vm9 = vcmp.eq.s32.totalorder %v198_v63, 2 }
  0xa6   : > { %v263_v0 = vsel %vm244_vm6, %v490_v20, 0.0  ;;  %v301_v1 = vsel %vm282_vm7, %v495_v21, 0.0  ;;  %v262_v2 = vsel %vm243_vm8, %v490_v20, 0.0  ;;  %v300_v3 = vsel %vm281_vm9, %v495_v21, 0.0 }
  0xa7   : > { %v320_v4 = vadd.f32 %v301_v1, %v263_v0  ;;  %v319_v5 = vadd.f32 %v300_v3, %v262_v2 }
  0xa8   : > { %v207_v6 = vpop.permute.xlu1 %206  ;;  %v204_v7 = vpop.permute.xlu0 %203 }
  0xa9   : > { %340 = vst.msk [vmem:[%s502_s22 + $0x58] sm:$0xff] %vm328_vm0, %v320_v4  ;;  %339 = vst.msk [vmem:[%s502_s22 + $0x50] sm:$0xff] %vm328_vm0, %v319_v5  ;;  %vm246_vm10 = vcmp.eq.s32.totalorder %v207_v6, 1  ;;  %vm284_vm11 = vcmp.eq.s32.totalorder %v207_v6, 2  ;;  %vm245_vm12 = vcmp.eq.s32.totalorder %v204_v7, 1  ;;  %vm283_vm13 = vcmp.eq.s32.totalorder %v204_v7, 2 }
  0xaa   : > { %v265_v8 = vsel %vm246_vm10, %v490_v20, 0.0  ;;  %v303_v9 = vsel %vm284_vm11, %v495_v21, 0.0  ;;  %v264_v10 = vsel %vm245_vm12, %v490_v20, 0.0  ;;  %v302_v11 = vsel %vm283_vm13, %v495_v21, 0.0 }
  0xab   : > { %v322_v12 = vadd.f32 %v303_v9, %v265_v8  ;;  %v321_v13 = vadd.f32 %v302_v11, %v264_v10 }
  0xac   : > { %v213_v14 = vpop.permute.xlu1 %212  ;;  %v210_v15 = vpop.permute.xlu0 %209 }
  0xad   : > { %342 = vst.msk [vmem:[%s502_s22 + $0x68] sm:$0xff] %vm328_vm0, %v322_v12  ;;  %341 = vst.msk [vmem:[%s502_s22 + $0x60] sm:$0xff] %vm328_vm0, %v321_v13  ;;  %vm248_vm14 = vcmp.eq.s32.totalorder %v213_v14, 1  ;;  %vm286_vm15 = vcmp.eq.s32.totalorder %v213_v14, 2  ;;  %vm247_vm1 = vcmp.eq.s32.totalorder %v210_v15, 1  ;;  %vm285_vm2 = vcmp.eq.s32.totalorder %v210_v15, 2 }
  0xae   : > { %v267_v16 = vsel %vm248_vm14, %v490_v20, 0.0  ;;  %v305_v17 = vsel %vm286_vm15, %v495_v21, 0.0  ;;  %v266_v18 = vsel %vm247_vm1, %v490_v20, 0.0  ;;  %v304_v19 = vsel %vm285_vm2, %v495_v21, 0.0 }
  0xaf   : > { %v324_v22 = vadd.f32 %v305_v17, %v267_v16  ;;  %v323_v23 = vadd.f32 %v304_v19, %v266_v18 }
  0xb0   : > { %v219_v24 = vpop.permute.xlu1 %218  ;;  %v216_v25 = vpop.permute.xlu0 %215 }
  0xb1   : > { %344 = vst.msk [vmem:[%s502_s22 + $0x78] sm:$0xff] %vm328_vm0, %v324_v22  ;;  %343 = vst.msk [vmem:[%s502_s22 + $0x70] sm:$0xff] %vm328_vm0, %v323_v23  ;;  %vm250_vm3 = vcmp.eq.s32.totalorder %v219_v24, 1  ;;  %vm288_vm4 = vcmp.eq.s32.totalorder %v219_v24, 2  ;;  %vm249_vm5 = vcmp.eq.s32.totalorder %v216_v25, 1  ;;  %vm287_vm6 = vcmp.eq.s32.totalorder %v216_v25, 2 }
  0xb2   : > { %v269_v26 = vsel %vm250_vm3, %v490_v20, 0.0  ;;  %v307_v27 = vsel %vm288_vm4, %v495_v21, 0.0  ;;  %v268_v28 = vsel %vm249_vm5, %v490_v20, 0.0  ;;  %v306_v29 = vsel %vm287_vm6, %v495_v21, 0.0 }
  0xb3   : > { %v326_v30 = vadd.f32 %v307_v27, %v269_v26  ;;  %v325_v31 = vadd.f32 %v306_v29, %v268_v28 }
  0xb4   : > { %v222_v32 = vpop.permute.xlu0 %221 }
  0xb5   : > { %346 = vst.msk [vmem:[%s502_s22 + $0x88] sm:$0xff] %vm328_vm0, %v326_v30  ;;  %345 = vst.msk [vmem:[%s502_s22 + $0x80] sm:$0xff] %vm328_vm0, %v325_v31  ;;  %vm251_vm7 = vcmp.eq.s32.totalorder %v222_v32, 1  ;;  %vm289_vm8 = vcmp.eq.s32.totalorder %v222_v32, 2 }
  0xb6   : > { %v270_v33 = vsel %vm251_vm7, %v490_v20, 0.0  ;;  %v308_v34 = vsel %vm289_vm8, %v495_v21, 0.0 }
  0xb7   : > { %v327_v35 = vadd.f32 %v308_v34, %v270_v33 }
  0xb9   : > { %347 = vst.msk [vmem:[%s502_s22 + $0x90] sm:$0xff] %vm328_vm0, %v327_v35 }
  0xba PF: > { %s12_s9 = sadd.s32 1, %s432_s9  }
  0xbb   : > { %p9_p4 = scmp.ge.s32.totalorder %s12_s9, 4  }
  0xbd   :  { %11 = sbr.rel (!%p9_p4) target bundleno = 1 (0x1), region = 58 }

</bundles_post_ra>
